<compile_context>
chip_gen: v5e
topology: v5e:2x2
jax: 0.10.0
libtpu: 0.0.40
codegen_flags: <defaults>
</compile_context>

<pallas_src>
import functools

import jax
import jax.numpy as jnp
from jax.experimental import pallas as pl
from jax.experimental.pallas import tpu as pltpu

BN_EPS = 1e-5
_VMEM_LIMIT = 32 * 1024 * 1024   # safe on v5e/v6e (128 MiB) and v7x (64 MiB)
_TM_CAP = 512                    # batch-tile cap (review: 512-1024; 512 keeps partial-
                                 # block compute waste small while amortizing step cost)


def _round_up(x, m):
    return ((x + m - 1) // m) * m


# ------------------------------- Pallas kernel -------------------------------

def _projector_kernel(x_ref, w1_ref, s1_ref, t1_ref, w2_ref, b2_ref, o_ref):
    # layer1: Linear + folded BatchNorm1d(eval) + ReLU.
    # bf16 operands -> MXU, f32 accumulation, f32 epilogue (v5e-friendly).
    h = jnp.dot(x_ref[...], w1_ref[...], preferred_element_type=jnp.float32)
    h = jnp.maximum(h * s1_ref[...] + t1_ref[...], 0.0)
    # layer2: Linear (+ bias). Hidden activation never leaves VMEM.
    out = jnp.dot(h.astype(jnp.bfloat16), w2_ref[...],
                  preferred_element_type=jnp.float32)
    o_ref[...] = (out + b2_ref[...]).astype(o_ref.dtype)


# -------------------------------- parameters ---------------------------------

def make_projector_params(key, in_dim, hidden_dim=512, out_dim=128):
    """Deterministic synthetic Projector weights (PyTorch Linear-style init).

    Stored pre-transposed, pre-padded to lane-aligned shapes and pre-cast to their
    kernel dtypes, so the forward pass does zero per-call weight preprocessing:
      w1: (kp, hp) bf16, w2: (hp, dp) bf16, s1/t1: (1, hp) f32, b2: (1, dp) f32.
    """
    k1, k2, k3, k4 = jax.random.split(key, 4)
    lim1 = 1.0 / jnp.sqrt(jnp.float32(in_dim))
    w1 = jax.random.uniform(k1, (in_dim, hidden_dim), jnp.float32, -lim1, lim1)
    b1 = jax.random.uniform(k2, (hidden_dim,), jnp.float32, -lim1, lim1)
    lim2 = 1.0 / jnp.sqrt(jnp.float32(hidden_dim))
    w2 = jax.random.uniform(k3, (hidden_dim, out_dim), jnp.float32, -lim2, lim2)
    b2 = jax.random.uniform(k4, (out_dim,), jnp.float32, -lim2, lim2)

    # BatchNorm1d (eval): y = gamma*(z-mean)/sqrt(var+eps) + beta, z = x@W1 + b1
    gamma = jnp.ones((hidden_dim,), jnp.float32)
    beta = jnp.zeros((hidden_dim,), jnp.float32)
    mean = jnp.zeros((hidden_dim,), jnp.float32)
    var = jnp.ones((hidden_dim,), jnp.float32)
    scale = gamma / jnp.sqrt(var + BN_EPS)
    shift = beta - mean * scale
    fused_scale = scale                    # applied to (x @ W1)
    fused_shift = b1 * scale + shift       # Linear bias folded through the BN affine

    # Lane-aligned padded layouts (zero padding is exact: zero rows/cols add nothing).
    kp = _round_up(in_dim, 128)
    hp = _round_up(hidden_dim, 128)
    dp = _round_up(out_dim, 128)

    def pad2(a, rows, cols, dtype):
        a = jnp.pad(a, ((0, rows - a.shape[0]), (0, cols - a.shape[1])))
        return a.astype(dtype)

    return {
        'w1': pad2(w1, kp, hp, jnp.bfloat16),                       # (kp, hp)
        'w2': pad2(w2, hp, dp, jnp.bfloat16),                       # (hp, dp)
        's1': pad2(fused_scale.reshape(1, -1), 1, hp, jnp.float32),  # (1, hp)
        't1': pad2(fused_shift.reshape(1, -1), 1, hp, jnp.float32),  # (1, hp)
        'b2': pad2(b2.reshape(1, -1), 1, dp, jnp.float32),           # (1, dp)
    }


# --------------------------------- forward -----------------------------------

@functools.partial(jax.jit, static_argnames=("out_dim",))
def projector_forward(params, x, out_dim):
    """x: (N, in_dim) f32 -> (N, out_dim) f32."""
    n, in_dim = x.shape
    kp, hp = params['w1'].shape
    dp = params['w2'].shape[1]

    # Batch tile: multiple of 16 (bf16 sublane packing), capped at _TM_CAP rows.
    # M is padded only to a multiple of 16; any remaining partial last block is
    # handled by Pallas (rows are independent, OOB output writes are masked).
    mp = _round_up(max(n, 1), 16)
    tm = min(_TM_CAP, mp)
    grid = pl.cdiv(mp, tm)

    # Input prep: single pad (M to mp, K to kp with exact zeros) + bf16 cast.
    x_p = x.astype(jnp.bfloat16)
    if (n, in_dim) != (mp, kp):
        x_p = jnp.pad(x_p, ((0, mp - n), (0, kp - in_dim)))

    bytes_accessed = (mp * kp * 2            # x (bf16)
                      + kp * hp * 2 + hp * dp * 2   # w1, w2 (bf16)
                      + (2 * hp + dp) * 4    # s1, t1, b2 (f32)
                      + mp * dp * 4)         # out (f32)

    out = pl.pallas_call(
        _projector_kernel,
        out_shape=jax.ShapeDtypeStruct((mp, dp), jnp.float32),
        grid_spec=pltpu.PrefetchScalarGridSpec(
            num_scalar_prefetch=0,
            grid=(grid,),
            in_specs=[
                pl.BlockSpec((tm, kp), lambda i: (i, 0)),   # x tile
                pl.BlockSpec((kp, hp), lambda i: (0, 0)),   # w1 (resident)
                pl.BlockSpec((1, hp), lambda i: (0, 0)),    # fused BN scale
                pl.BlockSpec((1, hp), lambda i: (0, 0)),    # fused BN shift (+bias)
                pl.BlockSpec((hp, dp), lambda i: (0, 0)),   # w2 (resident)
                pl.BlockSpec((1, dp), lambda i: (0, 0)),    # b2
            ],
            out_specs=pl.BlockSpec((tm, dp), lambda i: (i, 0)),
        ),
        compiler_params=pltpu.CompilerParams(
            # Batch-sharding across v7x's 2 TCs; a no-op for grid=(1,) (tiny batches),
            # amortizes the duplicated weight DMA once each core has several tiles.
            dimension_semantics=("parallel",),
            vmem_limit_bytes=_VMEM_LIMIT,
        ),
        cost_estimate=pl.CostEstimate(
            flops=2 * mp * (kp * hp + hp * dp),
            transcendentals=0,
            bytes_accessed=bytes_accessed,
        ),
    )(x_p, params['w1'], params['s1'], params['t1'], params['w2'], params['b2'])

    if n != mp or out_dim != dp:
        out = out[:n, :out_dim]
    return out


# ----------------------------------- main -------------------------------------

if __name__ == "__main__":
    in_dim, hidden_dim, out_dim = 512, 512, 128
    batch = 8

    key = jax.random.PRNGKey(0)
    k_param, k_x1, k_x2 = jax.random.split(key, 3)
    params = make_projector_params(k_param, in_dim, hidden_dim, out_dim)

    # Pseudo-siamese: the two branches share the projector. Concatenate them along
    # M and run ONE pallas_call so weight HBM traffic / launch cost is amortized.
    x1 = jax.random.normal(k_x1, (batch, in_dim), jnp.float32)
    x2 = jax.random.normal(k_x2, (batch, in_dim), jnp.float32)
    x = jnp.concatenate([x1, x2], axis=0)               # (2*batch, in_dim)

    out = jax.block_until_ready(projector_forward(params, x, out_dim=out_dim))
    z1, z2 = out[:batch], out[batch:]

    assert out.shape == (2 * batch, out_dim)
    assert z1.shape == (batch, out_dim) and z2.shape == (batch, out_dim)
    assert bool(jnp.all(jnp.isfinite(out)))

    # Pure-JAX reference along the same bf16-operand / f32-accumulation path.
    kp = params['w1'].shape[0]
    xb = jnp.pad(x, ((0, 0), (0, kp - in_dim))).astype(jnp.bfloat16).astype(jnp.float32)
    w1f = params['w1'].astype(jnp.float32)
    w2f = params['w2'].astype(jnp.float32)
    h_ref = jnp.maximum(xb @ w1f * params['s1'][0] + params['t1'][0], 0.0)
    ref = (h_ref.astype(jnp.bfloat16).astype(jnp.float32) @ w2f
           + params['b2'][0])[:, :out_dim]
    assert jnp.allclose(out, ref, rtol=5e-2, atol=5e-2), "mismatch vs JAX reference"

    print("KERNEL_OK")
</pallas_src>

<mosaic_0001>
module attributes {stable_mosaic.version = 11 : i64} {
  func.func @_projector_kernel(%arg0: i32, %arg1: memref<16x512xbf16, #tpu.memory_space<vmem>>, %arg2: memref<512x512xbf16, #tpu.memory_space<vmem>>, %arg3: memref<1x512xf32, #tpu.memory_space<vmem>>, %arg4: memref<1x512xf32, #tpu.memory_space<vmem>>, %arg5: memref<512x128xbf16, #tpu.memory_space<vmem>>, %arg6: memref<1x128xf32, #tpu.memory_space<vmem>>, %arg7: memref<16x128xf32, #tpu.memory_space<vmem>>) attributes {dimension_semantics = [#tpu.dimension_semantics<parallel>], iteration_bounds = array<i64: 1>, scalar_prefetch = 0 : i64, scratch_operands = 0 : i64, tpu.core_type = #tpu.core_type<tc>, window_params = [{transform_indices = @transform_0, window_bounds = array<i64: 16, 512>}, {pipeline_mode = #tpu.pipeline_mode<synchronous>, transform_indices = @transform_1, window_bounds = array<i64: 512, 512>}, {pipeline_mode = #tpu.pipeline_mode<synchronous>, transform_indices = @transform_2, window_bounds = array<i64: 1, 512>}, {pipeline_mode = #tpu.pipeline_mode<synchronous>, transform_indices = @transform_3, window_bounds = array<i64: 1, 512>}, {pipeline_mode = #tpu.pipeline_mode<synchronous>, transform_indices = @transform_4, window_bounds = array<i64: 512, 128>}, {pipeline_mode = #tpu.pipeline_mode<synchronous>, transform_indices = @transform_5, window_bounds = array<i64: 1, 128>}, {transform_indices = @transform_6, window_bounds = array<i64: 16, 128>}]} {
    %c0 = arith.constant 0 : index
    %c0_0 = arith.constant 0 : index
    %0 = vector.load %arg1[%c0, %c0_0] : memref<16x512xbf16, #tpu.memory_space<vmem>>, vector<16x512xbf16>
    %c0_1 = arith.constant 0 : index
    %c0_2 = arith.constant 0 : index
    %1 = vector.load %arg2[%c0_1, %c0_2] : memref<512x512xbf16, #tpu.memory_space<vmem>>, vector<512x512xbf16>
    %cst = arith.constant dense<0.000000e+00> : vector<16x512xf32>
    %2 = tpu.matmul %0, %1, %cst {dimension_numbers = #tpu.dot_dimension_numbers<[1], [0], [0], [1], [0, 0, 1, 1], [], []>} : vector<16x512xbf16>, vector<512x512xbf16>, vector<16x512xf32> -> vector<16x512xf32>
    %c0_3 = arith.constant 0 : index
    %c0_4 = arith.constant 0 : index
    %3 = vector.load %arg3[%c0_3, %c0_4] : memref<1x512xf32, #tpu.memory_space<vmem>>, vector<1x512xf32>
    %4 = vector.broadcast %3 : vector<1x512xf32> to vector<16x512xf32>
    %5 = arith.mulf %2, %4 : vector<16x512xf32>
    %c0_5 = arith.constant 0 : index
    %c0_6 = arith.constant 0 : index
    %6 = vector.load %arg4[%c0_5, %c0_6] : memref<1x512xf32, #tpu.memory_space<vmem>>, vector<1x512xf32>
    %7 = vector.broadcast %6 : vector<1x512xf32> to vector<16x512xf32>
    %8 = arith.addf %5, %7 : vector<16x512xf32>
    %cst_7 = arith.constant 0.000000e+00 : f32
    %9 = vector.broadcast %cst_7 : f32 to vector<16x512xf32>
    %10 = arith.maximumf %8, %9 : vector<16x512xf32>
    %11 = arith.truncf %10 : vector<16x512xf32> to vector<16x512xbf16>
    %c0_8 = arith.constant 0 : index
    %c0_9 = arith.constant 0 : index
    %12 = vector.load %arg5[%c0_8, %c0_9] : memref<512x128xbf16, #tpu.memory_space<vmem>>, vector<512x128xbf16>
    %cst_10 = arith.constant dense<0.000000e+00> : vector<16x128xf32>
    %13 = tpu.matmul %11, %12, %cst_10 {dimension_numbers = #tpu.dot_dimension_numbers<[1], [0], [0], [1], [0, 0, 1, 1], [], []>} : vector<16x512xbf16>, vector<512x128xbf16>, vector<16x128xf32> -> vector<16x128xf32>
    %c0_11 = arith.constant 0 : index
    %c0_12 = arith.constant 0 : index
    %14 = vector.load %arg6[%c0_11, %c0_12] : memref<1x128xf32, #tpu.memory_space<vmem>>, vector<1x128xf32>
    %15 = vector.broadcast %14 : vector<1x128xf32> to vector<16x128xf32>
    %16 = arith.addf %13, %15 : vector<16x128xf32>
    %c0_13 = arith.constant 0 : index
    %c0_14 = arith.constant 0 : index
    %17 = vector.load %arg7[%c0_13, %c0_14] : memref<16x128xf32, #tpu.memory_space<vmem>>, vector<16x128xf32>
    tpu.vector_store %arg7[%c0_13, %c0_14], %16 {strides = array<i32>} : memref<16x128xf32, #tpu.memory_space<vmem>>, vector<16x128xf32>,
    return
  }
  func.func @transform_0(%arg0: i32) -> (i32, i32) {
    %c0_i32 = arith.constant 0 : i32
    %c0_i32_0 = arith.constant 0 : i32
    return %arg0, %c0_i32 : i32, i32
  }
  func.func @transform_1(%arg0: i32) -> (i32, i32) {
    %c0_i32 = arith.constant 0 : i32
    %c0_i32_0 = arith.constant 0 : i32
    %c0_i32_1 = arith.constant 0 : i32
    return %c0_i32, %c0_i32_0 : i32, i32
  }
  func.func @transform_2(%arg0: i32) -> (i32, i32) {
    %c0_i32 = arith.constant 0 : i32
    %c0_i32_0 = arith.constant 0 : i32
    %c0_i32_1 = arith.constant 0 : i32
    return %c0_i32, %c0_i32_0 : i32, i32
  }
  func.func @transform_3(%arg0: i32) -> (i32, i32) {
    %c0_i32 = arith.constant 0 : i32
    %c0_i32_0 = arith.constant 0 : i32
    %c0_i32_1 = arith.constant 0 : i32
    return %c0_i32, %c0_i32_0 : i32, i32
  }
  func.func @transform_4(%arg0: i32) -> (i32, i32) {
    %c0_i32 = arith.constant 0 : i32
    %c0_i32_0 = arith.constant 0 : i32
    %c0_i32_1 = arith.constant 0 : i32
    return %c0_i32, %c0_i32_0 : i32, i32
  }
  func.func @transform_5(%arg0: i32) -> (i32, i32) {
    %c0_i32 = arith.constant 0 : i32
    %c0_i32_0 = arith.constant 0 : i32
    %c0_i32_1 = arith.constant 0 : i32
    return %c0_i32, %c0_i32_0 : i32, i32
  }
  func.func @transform_6(%arg0: i32) -> (i32, i32) {
    %c0_i32 = arith.constant 0 : i32
    %c0_i32_0 = arith.constant 0 : i32
    return %arg0, %c0_i32 : i32, i32
  }
}

</mosaic_0001>

<bundles_post_ra>
// kernel: projector_forward.1
= control target key start
LH: loop header
LB: loop body
LE: loop exit
PB: predicated region body
PF: predicated region fallthrough
CT: control target
= control target key end

     0   :  { %11 = vsyncpa [#allocation3], 0  ;;  %s2488_s0 = inlined_call_operand.vmem [shape: bf16[16,512], index: 0, kind: input, shape index: {}]   ;;  %s2489_s1 = inlined_call_operand.hbm [shape: bf16[512,512], index: 1, kind: input, shape index: {}]   ;;  %s2490_s2 = inlined_call_operand.vmem [shape: f32[1,512], index: 2, kind: input, shape index: {}]   ;;  %s2491_s3 = inlined_call_operand.vmem [shape: f32[1,512], index: 3, kind: input, shape index: {}]   ;;  %s2492_s4 = inlined_call_operand.hbm [shape: bf16[512,128], index: 4, kind: input, shape index: {}]   ;;  %s2493_s5 = inlined_call_operand.vmem [shape: f32[1,128], index: 5, kind: input, shape index: {}]   ;;  %s2494_s6 = inlined_call_operand.hbm [shape: f32[16,128], index: 6, kind: output, shape index: {}]  }
   0x1   :  { %12 = vsyncpa [#allocation6], 0 }
   0x2   :  { %13 = vsyncpa [#allocation4], 0  ;;  %s20_s23 = sshll.u32 %s2489_s1, 4  ;;  %s2366_s24 = smov [#allocation2]   ;;  %s21_s23 = int_to_ptr.hbm [resolvable:$true] %s20_s23 }
   0x3   :  { %s22_s25 = sshll.u32 %s2366_s24, 4  ;;  %s37_s28 = sshll.u32 %s2492_s4, 4  ;;  %s23_s25 = int_to_ptr.vmem [resolvable:$true] %s22_s25  ;;  %s38_s28 = int_to_ptr.hbm [resolvable:$true] %s37_s28 }
   0x4   :  { %s2367_s29 = smov 256   ;;  %s2368_s30 = smov 16  }
   0x5   :  { %28 = dma.hbm_to_vmem [thread:$0]  %s21_s23, 16384, %s23_s25, [#allocation3], %s2367_s29, %s2367_s29, %s2368_s30  }
   0x6   :  { %s2369_s7 = smov [#allocation5]   ;;  %s2370_s9 = smov 64  }
   0x7   :  { %s39_s8 = sshll.u32 %s2369_s7, 4  ;;  %s2371_s10 = smov 4   ;;  %s40_s8 = int_to_ptr.vmem [resolvable:$true] %s39_s8 }
   0x8   :  { %45 = dma.hbm_to_vmem [thread:$0]  %s38_s28, 4096, %s40_s8, [#allocation6], %s2370_s9, %s2370_s9, %s2371_s10  }
   0x9   :  { %2360 = dma.done.wait [#allocation3], 16384  }
   0xa   :  { %2361 = vsyncadd [#allocation3], 4294950912 }
   0xb   :  { %2362 = dma.done.wait [#allocation6], 4096  }
   0xc   :  { %2363 = vsyncadd [#allocation6], 4294963200  ;;  %v1588_v0 = vld [vmem:[#allocation2 + $0xe0] sm:$0xf]  ;;  %v2148_v1 = vld [vmem:[#allocation2 + $0xec] sm:$0xf0] }
   0xd   :  { %v1716_v2 = vld [vmem:[#allocation2 + $0x1e0] sm:$0xf]  ;;  %v1589_v3 = vor.u32 %v2148_v1, %v1588_v0  ;;  %v2180_v4 = vld [vmem:[#allocation2 + $0x1ec] sm:$0xf0]  ;;  %s2372_s28 = smov [#allocation7]   ;;  %s1444_s8 = sshll.u32 %s2494_s6, 4  ;;  %s1445_s8 = int_to_ptr.hbm [resolvable:$true] %s1444_s8 }
   0xe   :  { %v1844_v5 = vld [vmem:[#allocation2 + $0x2e0] sm:$0xf]  ;;  %v2212_v6 = vld [vmem:[#allocation2 + $0x2ec] sm:$0xf0]  ;;  %v1717_v7 = vor.u32 %v2180_v4, %v1716_v2  ;;  %s1442_s29 = sshll.u32 %s2372_s28, 4  ;;  %s2374_s9 = smov 8   ;;  %s1443_s29 = int_to_ptr.vmem [resolvable:$true] %s1442_s29 }
   0xf   :  { %v1845_v8 = vor.u32 %v2212_v6, %v1844_v5  ;;  %v1972_v9 = vld [vmem:[#allocation2 + $0x3e0] sm:$0xf]  ;;  %v2244_v10 = vld [vmem:[#allocation2 + $0x3ec] sm:$0xf0]  ;;  %848 = vmatpush.bf16.msra.mxu0 %v1589_v3 }
  0x10   :  { %v1572_v11 = vld [vmem:[#allocation2 + $0xc0] sm:$0xf]  ;;  %v1973_v12 = vor.u32 %v2244_v10, %v1972_v9  ;;  %v2144_v13 = vld [vmem:[#allocation2 + $0xcc] sm:$0xf0]  ;;  %862 = vmatpush.bf16.msra.mxu1 %v1717_v7 }
  0x11   :  { %v1700_v14 = vld [vmem:[#allocation2 + $0x1c0] sm:$0xf]  ;;  %v2176_v15 = vld [vmem:[#allocation2 + $0x1cc] sm:$0xf0]  ;;  %876 = vmatpush.bf16.msra.mxu2 %v1845_v8  ;;  %v1573_v16 = vor.u32 %v2144_v13, %v1572_v11 }
  0x12   :  { %v1701_v17 = vor.u32 %v2176_v15, %v1700_v14  ;;  %v1828_v18 = vld [vmem:[#allocation2 + $0x2c0] sm:$0xf]  ;;  %v2208_v19 = vld [vmem:[#allocation2 + $0x2cc] sm:$0xf0]  ;;  %890 = vmatpush.bf16.msra.mxu3 %v1973_v12 }
  0x13   :  { %v1956_v20 = vld [vmem:[#allocation2 + $0x3c0] sm:$0xf]  ;;  %v1829_v21 = vor.u32 %v2208_v19, %v1828_v18  ;;  %v2240_v22 = vld [vmem:[#allocation2 + $0x3cc] sm:$0xf0]  ;;  %849 = vmatpush.bf16.msra.mxu0 %v1573_v16 }
  0x14   :  { %v1556_v23 = vld [vmem:[#allocation2 + $0xa0] sm:$0xf]  ;;  %v2140_v24 = vld [vmem:[#allocation2 + $0xac] sm:$0xf0]  ;;  %v1957_v25 = vor.u32 %v2240_v22, %v1956_v20  ;;  %863 = vmatpush.bf16.msra.mxu1 %v1701_v17 }
  0x15   :  { %v1684_v26 = vld [vmem:[#allocation2 + $0x1a0] sm:$0xf]  ;;  %v2172_v27 = vld [vmem:[#allocation2 + $0x1ac] sm:$0xf0]  ;;  %v1557_v29 = vor.u32 %v2140_v24, %v1556_v23  ;;  %877 = vmatpush.bf16.msra.mxu2 %v1829_v21 }
  0x16   :  { %v1812_v28 = vld [vmem:[#allocation2 + $0x2a0] sm:$0xf]  ;;  %v2204_v30 = vld [vmem:[#allocation2 + $0x2ac] sm:$0xf0]  ;;  %v1685_v33 = vor.u32 %v2172_v27, %v1684_v26  ;;  %891 = vmatpush.bf16.msra.mxu3 %v1957_v25 }
  0x17   :  { %v1940_v31 = vld [vmem:[#allocation2 + $0x3a0] sm:$0xf]  ;;  %v2236_v32 = vld [vmem:[#allocation2 + $0x3ac] sm:$0xf0]  ;;  %v1813_v34 = vor.u32 %v2204_v30, %v1812_v28  ;;  %850 = vmatpush.bf16.msra.mxu0 %v1557_v29  ;;  %v2146_v28 = vld [vmem:[#allocation2 + $0xe4] sm:$0xf] }
  0x18   :  { %v1540_v35 = vld [vmem:[#allocation2 + $0x80] sm:$0xf]  ;;  %v2136_v36 = vld [vmem:[#allocation2 + $0x8c] sm:$0xf0]  ;;  %v1941_v38 = vor.u32 %v2236_v32, %v1940_v31  ;;  %864 = vmatpush.bf16.msra.mxu1 %v1685_v33  ;;  %v1590_v29 = vld [vmem:[#allocation2 + $0xf0] sm:$0xf0] }
  0x19   :  { %v1668_v37 = vld [vmem:[#allocation2 + $0x180] sm:$0xf]  ;;  %v2168_v39 = vld [vmem:[#allocation2 + $0x18c] sm:$0xf0]  ;;  %v1541_v44 = vor.u32 %v2136_v36, %v1540_v35  ;;  %878 = vmatpush.bf16.msra.mxu2 %v1813_v34  ;;  %v2178_v30 = vld [vmem:[#allocation2 + $0x1e4] sm:$0xf] }
  0x1a   :  { %v1796_v40 = vld [vmem:[#allocation2 + $0x280] sm:$0xf]  ;;  %v2200_v41 = vld [vmem:[#allocation2 + $0x28c] sm:$0xf0]  ;;  %v1669_v45 = vor.u32 %v2168_v39, %v1668_v37  ;;  %892 = vmatpush.bf16.msra.mxu3 %v1941_v38  ;;  %v1718_v32 = vld [vmem:[#allocation2 + $0x1f0] sm:$0xf0] }
  0x1b   :  { %v1924_v42 = vld [vmem:[#allocation2 + $0x380] sm:$0xf]  ;;  %v2232_v43 = vld [vmem:[#allocation2 + $0x38c] sm:$0xf0]  ;;  %v1797_v46 = vor.u32 %v2200_v41, %v1796_v40  ;;  %851 = vmatpush.bf16.msra.mxu0 %v1541_v44  ;;  %v2210_v33 = vld [vmem:[#allocation2 + $0x2e4] sm:$0xf]  ;;  %v1593_v40 = vor.u32 %v2146_v28, %v1590_v29 }
  0x1c   :  { %v1524_v47 = vld [vmem:[#allocation2 + $0x60] sm:$0xf]  ;;  %v2132_v48 = vld [vmem:[#allocation2 + $0x6c] sm:$0xf0]  ;;  %v1925_v50 = vor.u32 %v2232_v43, %v1924_v42  ;;  %865 = vmatpush.bf16.msra.mxu1 %v1669_v45  ;;  %v1846_v34 = vld [vmem:[#allocation2 + $0x2f0] sm:$0xf0]  ;;  %v1721_v43 = vor.u32 %v2178_v30, %v1718_v32 }
  0x1d   :  { %v1652_v49 = vld [vmem:[#allocation2 + $0x160] sm:$0xf]  ;;  %v2164_v51 = vld [vmem:[#allocation2 + $0x16c] sm:$0xf0]  ;;  %v1525_v56 = vor.u32 %v2132_v48, %v1524_v47  ;;  %879 = vmatpush.bf16.msra.mxu2 %v1797_v46  ;;  %v2242_v37 = vld [vmem:[#allocation2 + $0x3e4] sm:$0xf]  ;;  %v1849_v44 = vor.u32 %v2210_v33, %v1846_v34 }
  0x1e   :  { %v1780_v52 = vld [vmem:[#allocation2 + $0x260] sm:$0xf]  ;;  %v2196_v53 = vld [vmem:[#allocation2 + $0x26c] sm:$0xf0]  ;;  %v1653_v57 = vor.u32 %v2164_v51, %v1652_v49  ;;  %893 = vmatpush.bf16.msra.mxu3 %v1925_v50  ;;  %v1974_v38 = vld [vmem:[#allocation2 + $0x3f0] sm:$0xf0] }
  0x1f   :  { %v1908_v54 = vld [vmem:[#allocation2 + $0x360] sm:$0xf]  ;;  %v2228_v55 = vld [vmem:[#allocation2 + $0x36c] sm:$0xf0]  ;;  %v1781_v58 = vor.u32 %v2196_v53, %v1780_v52  ;;  %852 = vmatpush.bf16.msra.mxu0 %v1525_v56  ;;  %v2142_v41 = vld [vmem:[#allocation2 + $0xc4] sm:$0xf]  ;;  %v1977_v48 = vor.u32 %v2242_v37, %v1974_v38 }
  0x20   :  { %v1508_v59 = vld [vmem:[#allocation2 + $0x40] sm:$0xf]  ;;  %v2128_v60 = vld [vmem:[#allocation2 + $0x4c] sm:$0xf0]  ;;  %v1909_v62 = vor.u32 %v2228_v55, %v1908_v54  ;;  %866 = vmatpush.bf16.msra.mxu1 %v1653_v57  ;;  %v1574_v42 = vld [vmem:[#allocation2 + $0xd0] sm:$0xf0] }
  0x21   :  { %v1636_v61 = vld [vmem:[#allocation2 + $0x140] sm:$0xf]  ;;  %v2160_v63 = vld [vmem:[#allocation2 + $0x14c] sm:$0xf0]  ;;  %v1509_v4 = vor.u32 %v2128_v60, %v1508_v59  ;;  %880 = vmatpush.bf16.msra.mxu2 %v1781_v58  ;;  %v2174_v45 = vld [vmem:[#allocation2 + $0x1c4] sm:$0xf]  ;;  %v1577_v55 = vor.u32 %v2142_v41, %v1574_v42 }
  0x22   :  { %v1764_v0 = vld [vmem:[#allocation2 + $0x240] sm:$0xf]  ;;  %v2192_v1 = vld [vmem:[#allocation2 + $0x24c] sm:$0xf0]  ;;  %v1637_v5 = vor.u32 %v2160_v63, %v1636_v61  ;;  %894 = vmatpush.bf16.msra.mxu3 %v1909_v62  ;;  %v1702_v46 = vld [vmem:[#allocation2 + $0x1d0] sm:$0xf0] }
  0x23   :  { %v1892_v2 = vld [vmem:[#allocation2 + $0x340] sm:$0xf]  ;;  %v2224_v3 = vld [vmem:[#allocation2 + $0x34c] sm:$0xf0]  ;;  %v1765_v6 = vor.u32 %v2192_v1, %v1764_v0  ;;  %853 = vmatpush.bf16.msra.mxu0 %v1509_v4  ;;  %v2206_v47 = vld [vmem:[#allocation2 + $0x2c4] sm:$0xf]  ;;  %v1705_v60 = vor.u32 %v2174_v45, %v1702_v46 }
  0x24   :  { %v1492_v7 = vld [vmem:[#allocation2 + $0x20] sm:$0xf]  ;;  %v2124_v8 = vld [vmem:[#allocation2 + $0x2c] sm:$0xf0]  ;;  %v1893_v10 = vor.u32 %v2224_v3, %v1892_v2  ;;  %867 = vmatpush.bf16.msra.mxu1 %v1637_v5  ;;  %v1830_v49 = vld [vmem:[#allocation2 + $0x2d0] sm:$0xf0] }
  0x25   :  { %v1620_v9 = vld [vmem:[#allocation2 + $0x120] sm:$0xf]  ;;  %v2156_v11 = vld [vmem:[#allocation2 + $0x12c] sm:$0xf0]  ;;  %v1493_v16 = vor.u32 %v2124_v8, %v1492_v7  ;;  %881 = vmatpush.bf16.msra.mxu2 %v1765_v6  ;;  %v2238_v50 = vld [vmem:[#allocation2 + $0x3c4] sm:$0xf]  ;;  %v1833_v61 = vor.u32 %v2206_v47, %v1830_v49 }
  0x26   :  { %v1748_v12 = vld [vmem:[#allocation2 + $0x220] sm:$0xf]  ;;  %v2188_v13 = vld [vmem:[#allocation2 + $0x22c] sm:$0xf0]  ;;  %v1621_v19 = vor.u32 %v2156_v11, %v1620_v9  ;;  %895 = vmatpush.bf16.msra.mxu3 %v1893_v10  ;;  %v1958_v51 = vld [vmem:[#allocation2 + $0x3d0] sm:$0xf0] }
  0x27   :  { %v1876_v14 = vld [vmem:[#allocation2 + $0x320] sm:$0xf]  ;;  %v2220_v15 = vld [vmem:[#allocation2 + $0x32c] sm:$0xf0]  ;;  %v1749_v20 = vor.u32 %v2188_v13, %v1748_v12  ;;  %854 = vmatpush.bf16.msra.mxu0 %v1493_v16  ;;  %v1468_v52 = vld [vmem:[%s2488_s0 + $0x8] sm:$0xf]  ;;  %v1961_v2 = vor.u32 %v2238_v50, %v1958_v51 }
  0x28   :  { %v1476_v17 = vld [vmem:[#allocation2] sm:$0xf]  ;;  %v2120_v18 = vld [vmem:[#allocation2 + $0xc] sm:$0xf0]  ;;  %v1877_v24 = vor.u32 %v2220_v15, %v1876_v14  ;;  %868 = vmatpush.bf16.msra.mxu1 %v1621_v19  ;;  %v2117_v53 = vld [vmem:[%s2488_s0 + $0x14] sm:$0xf0] }
  0x29   :  { %v1604_v21 = vld [vmem:[#allocation2 + $0x100] sm:$0xf]  ;;  %v2152_v22 = vld [vmem:[#allocation2 + $0x10c] sm:$0xf0]  ;;  %v1477_v31 = vor.u32 %v2120_v18, %v1476_v17  ;;  %882 = vmatpush.bf16.msra.mxu2 %v1749_v20  ;;  %v2115_v54 = vld [vmem:[%s2488_s0 + $0xc] sm:$0xf]  ;;  %v2425_v58 = vor.u32 %v2117_v53, %v1468_v52 }
  0x2a   :  { %v1732_v23 = vld [vmem:[#allocation2 + $0x200] sm:$0xf]  ;;  %v2184_v25 = vld [vmem:[#allocation2 + $0x20c] sm:$0xf0]  ;;  %v1605_v35 = vor.u32 %v2152_v22, %v1604_v21  ;;  %896 = vmatpush.bf16.msra.mxu3 %v1877_v24  ;;  %v2138_v56 = vld [vmem:[#allocation2 + $0xa4] sm:$0xf] }
  0x2b   :  { %v1860_v26 = vld [vmem:[#allocation2 + $0x300] sm:$0xf]  ;;  %v2216_v27 = vld [vmem:[#allocation2 + $0x30c] sm:$0xf0]  ;;  %v1733_v36 = vor.u32 %v2184_v25, %v1732_v23  ;;  %855 = vmatpush.bf16.msra.mxu0 %v1477_v31  ;;  %v1558_v57 = vld [vmem:[#allocation2 + $0xb0] sm:$0xf0] }
  0x2c   :  { %v1861_v39 = vor.u32 %v2216_v27, %v1860_v26  ;;  %869 = vmatpush.bf16.msra.mxu1 %v1605_v35  ;;  %v1470_v59 = vld [vmem:[%s2488_s0 + $0x18] sm:$0xf0]  ;;  %v2170_v62 = vld [vmem:[#allocation2 + $0x1a4] sm:$0xf]  ;;  %v1686_v63 = vld [vmem:[#allocation2 + $0x1b0] sm:$0xf0]  ;;  %v1561_v9 = vor.u32 %v2138_v56, %v1558_v57 }
  0x2d   :  { %883 = vmatpush.bf16.msra.mxu2 %v1733_v36  ;;  %v2202_v0 = vld [vmem:[#allocation2 + $0x2a4] sm:$0xf]  ;;  %v2430_v1 = vor.u32 %v2115_v54, %v1470_v59  ;;  %v1814_v3 = vld [vmem:[#allocation2 + $0x2b0] sm:$0xf0]  ;;  %v1460_v6 = vld [vmem:[%s2488_s0] sm:$0xf]  ;;  %v1689_v12 = vor.u32 %v2170_v62, %v1686_v63 }
  0x2e   :  { %897 = vmatpush.bf16.msra.mxu3 %v1861_v39  ;;  %v2234_v4 = vld [vmem:[#allocation2 + $0x3a4] sm:$0xf]  ;;  %v1942_v5 = vld [vmem:[#allocation2 + $0x3b0] sm:$0xf0]  ;;  %v2116_v7 = vld [vmem:[%s2488_s0 + $0xc] sm:$0xf0]  ;;  %v1817_v13 = vor.u32 %v2202_v0, %v1814_v3 }
  0x2f   :  { %904 = vmatpush.bf16.msrb.mxu0 %v1593_v40  ;;  %v2114_v8 = vld [vmem:[%s2488_s0 + $0x4] sm:$0xf]  ;;  %v2443_v10 = vor.u32 %v2116_v7, %v1460_v6  ;;  %v1462_v11 = vld [vmem:[%s2488_s0 + $0x10] sm:$0xf0]  ;;  %v1945_v18 = vor.u32 %v2234_v4, %v1942_v5 }
  0x30   :  { %918 = vmatpush.bf16.msrb.mxu1 %v1721_v43  ;;  %884 = vmatmul.bf16.vlgmr.msra.gmra.mxu2 %v2425_v58  ;;  %v2134_v14 = vld [vmem:[#allocation2 + $0x84] sm:$0xf]  ;;  %v1542_v15 = vld [vmem:[#allocation2 + $0x90] sm:$0xf0]  ;;  %v2448_v17 = vor.u32 %v2114_v8, %v1462_v11  ;;  %v1596_v11 = vld [vmem:[#allocation2 + $0xe8] sm:$0xf] }
  0x31   :  { %932 = vmatpush.bf16.msrb.mxu2 %v1849_v44  ;;  %898 = vmatmul.bf16.vlgmr.msra.gmra.mxu3 %v2430_v1  ;;  %v2166_v16 = vld [vmem:[#allocation2 + $0x184] sm:$0xf]  ;;  %v1670_v19 = vld [vmem:[#allocation2 + $0x190] sm:$0xf0]  ;;  %v1545_v24 = vor.u32 %v2134_v14, %v1542_v15  ;;  %v2181_v15 = vld [vmem:[#allocation2 + $0x1f4] sm:$0xf0] }
  0x32   :  { %946 = vmatpush.bf16.msrb.mxu3 %v1977_v48  ;;  %v2198_v20 = vld [vmem:[#allocation2 + $0x284] sm:$0xf]  ;;  %v1798_v21 = vld [vmem:[#allocation2 + $0x290] sm:$0xf0]  ;;  %856 = vmatmul.bf16.vlgmr.msra.gmra.mxu0 %v2443_v10  ;;  %v1673_v25 = vor.u32 %v2166_v16, %v1670_v19  ;;  %v1852_v16 = vld [vmem:[#allocation2 + $0x2e8] sm:$0xf] }
  0x33   :  { %905 = vmatpush.bf16.msrb.mxu0 %v1577_v55  ;;  %v2230_v22 = vld [vmem:[#allocation2 + $0x384] sm:$0xf]  ;;  %v1926_v23 = vld [vmem:[#allocation2 + $0x390] sm:$0xf0]  ;;  %870 = vmatmul.bf16.vlgmr.msra.gmra.mxu1 %v2448_v17  ;;  %v1801_v26 = vor.u32 %v2198_v20, %v1798_v21  ;;  %v1980_v21 = vld [vmem:[#allocation2 + $0x3e8] sm:$0xf] }
  0x34   :  { %919 = vmatpush.bf16.msrb.mxu1 %v1705_v60  ;;  %v2130_v27 = vld [vmem:[#allocation2 + $0x64] sm:$0xf]  ;;  %v1526_v28 = vld [vmem:[#allocation2 + $0x70] sm:$0xf0]  ;;  %v1929_v30 = vor.u32 %v2230_v22, %v1926_v23  ;;  %v2245_v22 = vld [vmem:[#allocation2 + $0x3f4] sm:$0xf0] }
  0x35   :  { %933 = vmatpush.bf16.msrb.mxu2 %v1833_v61  ;;  %v2162_v29 = vld [vmem:[#allocation2 + $0x164] sm:$0xf]  ;;  %v1654_v31 = vld [vmem:[#allocation2 + $0x170] sm:$0xf0]  ;;  %v1529_v36 = vor.u32 %v2130_v27, %v1526_v28  ;;  %v1580_v27 = vld [vmem:[#allocation2 + $0xc8] sm:$0xf] }
  0x36   :  { %947 = vmatpush.bf16.msrb.mxu3 %v1961_v2  ;;  %v2194_v32 = vld [vmem:[#allocation2 + $0x264] sm:$0xf]  ;;  %v1782_v33 = vld [vmem:[#allocation2 + $0x270] sm:$0xf0]  ;;  %v1657_v37 = vor.u32 %v2162_v29, %v1654_v31  ;;  %v2145_v28 = vld [vmem:[#allocation2 + $0xd4] sm:$0xf0] }
  0x37   :  { %906 = vmatpush.bf16.msrb.mxu0 %v1561_v9  ;;  %v2226_v34 = vld [vmem:[#allocation2 + $0x364] sm:$0xf]  ;;  %v1910_v35 = vld [vmem:[#allocation2 + $0x370] sm:$0xf0]  ;;  %v1785_v38 = vor.u32 %v2194_v32, %v1782_v33  ;;  %v1708_v29 = vld [vmem:[#allocation2 + $0x1c8] sm:$0xf] }
  0x38   :  { %920 = vmatpush.bf16.msrb.mxu1 %v1689_v12  ;;  %v2126_v39 = vld [vmem:[#allocation2 + $0x44] sm:$0xf]  ;;  %v1510_v40 = vld [vmem:[#allocation2 + $0x50] sm:$0xf0]  ;;  %v1913_v42 = vor.u32 %v2226_v34, %v1910_v35  ;;  %v2149_v12 = vld [vmem:[#allocation2 + $0xf4] sm:$0xf0] }
  0x39   :  { %934 = vmatpush.bf16.msrb.mxu2 %v1817_v13  ;;  %v2158_v41 = vld [vmem:[#allocation2 + $0x144] sm:$0xf]  ;;  %v1638_v43 = vld [vmem:[#allocation2 + $0x150] sm:$0xf0]  ;;  %v1513_v48 = vor.u32 %v2126_v39, %v1510_v40  ;;  %v1724_v13 = vld [vmem:[#allocation2 + $0x1e8] sm:$0xf] }
  0x3a   :  { %948 = vmatpush.bf16.msrb.mxu3 %v1945_v18  ;;  %v2190_v44 = vld [vmem:[#allocation2 + $0x244] sm:$0xf]  ;;  %v1766_v45 = vld [vmem:[#allocation2 + $0x250] sm:$0xf0]  ;;  %v1641_v49 = vor.u32 %v2158_v41, %v1638_v43  ;;  %v2213_v18 = vld [vmem:[#allocation2 + $0x2f4] sm:$0xf0] }
  0x3b   :  { %907 = vmatpush.bf16.msrb.mxu0 %v1545_v24  ;;  %v2222_v46 = vld [vmem:[#allocation2 + $0x344] sm:$0xf]  ;;  %v1894_v47 = vld [vmem:[#allocation2 + $0x350] sm:$0xf0]  ;;  %v1769_v50 = vor.u32 %v2190_v44, %v1766_v45  ;;  %v1597_v24 = vor.u32 %v2149_v12, %v1596_v11  ;;  %v2177_v31 = vld [vmem:[#allocation2 + $0x1d4] sm:$0xf0] }
  0x3c   :  { %921 = vmatpush.bf16.msrb.mxu1 %v1673_v25  ;;  %v2122_v51 = vld [vmem:[#allocation2 + $0x24] sm:$0xf]  ;;  %v1494_v52 = vld [vmem:[#allocation2 + $0x30] sm:$0xf0]  ;;  %v1897_v54 = vor.u32 %v2222_v46, %v1894_v47  ;;  %v1725_v25 = vor.u32 %v2181_v15, %v1724_v13  ;;  %v1836_v32 = vld [vmem:[#allocation2 + $0x2c8] sm:$0xf] }
  0x3d   :  { %935 = vmatpush.bf16.msrb.mxu2 %v1801_v26  ;;  %v2154_v53 = vld [vmem:[#allocation2 + $0x124] sm:$0xf]  ;;  %v1622_v55 = vld [vmem:[#allocation2 + $0x130] sm:$0xf0]  ;;  %v1497_v61 = vor.u32 %v2122_v51, %v1494_v52  ;;  %v1853_v26 = vor.u32 %v2213_v18, %v1852_v16  ;;  %v2209_v33 = vld [vmem:[#allocation2 + $0x2d4] sm:$0xf0] }
  0x3e   :  { %949 = vmatpush.bf16.msrb.mxu3 %v1929_v30  ;;  %v2186_v56 = vld [vmem:[#allocation2 + $0x224] sm:$0xf]  ;;  %v1750_v57 = vld [vmem:[#allocation2 + $0x230] sm:$0xf0]  ;;  %v1625_v0 = vor.u32 %v2154_v53, %v1622_v55  ;;  %v1981_v30 = vor.u32 %v2245_v22, %v1980_v21  ;;  %v1964_v34 = vld [vmem:[#allocation2 + $0x3c8] sm:$0xf] }
  0x3f   :  { %908 = vmatpush.bf16.msrb.mxu0 %v1529_v36  ;;  %v2218_v59 = vld [vmem:[#allocation2 + $0x324] sm:$0xf]  ;;  %v1878_v60 = vld [vmem:[#allocation2 + $0x330] sm:$0xf0]  ;;  %v1753_v2 = vor.u32 %v2186_v56, %v1750_v57  ;;  %v2241_v35 = vld [vmem:[#allocation2 + $0x3d4] sm:$0xf0]  ;;  %v1581_v36 = vor.u32 %v2145_v28, %v1580_v27 }
  0x40   :  { %922 = vmatpush.bf16.msrb.mxu1 %v1657_v37  ;;  %v2118_v62 = vld [vmem:[#allocation2 + $0x4] sm:$0xf]  ;;  %v1478_v63 = vld [vmem:[#allocation2 + $0x10] sm:$0xf0]  ;;  %v1881_v6 = vor.u32 %v2218_v59, %v1878_v60  ;;  %v1709_v37 = vor.u32 %v2177_v31, %v1708_v29  ;;  %v1564_v39 = vld [vmem:[#allocation2 + $0xa8] sm:$0xf] }
  0x41   :  { %936 = vmatpush.bf16.msrb.mxu2 %v1785_v38  ;;  %v2150_v3 = vld [vmem:[#allocation2 + $0x104] sm:$0xf]  ;;  %v1606_v4 = vld [vmem:[#allocation2 + $0x110] sm:$0xf0]  ;;  %v1481_v14 = vor.u32 %v2118_v62, %v1478_v63  ;;  %v1837_v38 = vor.u32 %v2209_v33, %v1836_v32  ;;  %v2141_v40 = vld [vmem:[#allocation2 + $0xb4] sm:$0xf0] }
  0x42   :  { %950 = vmatpush.bf16.msrb.mxu3 %v1913_v42  ;;  %v2182_v5 = vld [vmem:[#allocation2 + $0x204] sm:$0xf]  ;;  %v1734_v7 = vld [vmem:[#allocation2 + $0x210] sm:$0xf0]  ;;  %v1609_v19 = vor.u32 %v2150_v3, %v1606_v4  ;;  %v1692_v41 = vld [vmem:[#allocation2 + $0x1a8] sm:$0xf]  ;;  %v1965_v42 = vor.u32 %v2241_v35, %v1964_v34 }
  0x43   :  { %909 = vmatpush.bf16.msrb.mxu0 %v1513_v48  ;;  %v2214_v8 = vld [vmem:[#allocation2 + $0x304] sm:$0xf]  ;;  %v1862_v9 = vld [vmem:[#allocation2 + $0x310] sm:$0xf0]  ;;  %v1737_v20 = vor.u32 %v2182_v5, %v1734_v7  ;;  %v2173_v43 = vld [vmem:[#allocation2 + $0x1b4] sm:$0xf0]  ;;  %v1565_v48 = vor.u32 %v2141_v40, %v1564_v39 }
  0x44   :  { %923 = vmatpush.bf16.msrb.mxu1 %v1641_v49  ;;  %v1865_v23 = vor.u32 %v2214_v8, %v1862_v9  ;;  %v1820_v44 = vld [vmem:[#allocation2 + $0x2a8] sm:$0xf]  ;;  %v2205_v45 = vld [vmem:[#allocation2 + $0x2b4] sm:$0xf0]  ;;  %v1693_v49 = vor.u32 %v2173_v43, %v1692_v41 }
  0x45   :  { %937 = vmatpush.bf16.msrb.mxu2 %v1769_v50  ;;  %v1948_v46 = vld [vmem:[#allocation2 + $0x3a8] sm:$0xf]  ;;  %v2237_v47 = vld [vmem:[#allocation2 + $0x3b4] sm:$0xf0]  ;;  %v1821_v50 = vor.u32 %v2205_v45, %v1820_v44 }
  0x46   :  { %951 = vmatpush.bf16.msrb.mxu3 %v1897_v54  ;;  %v1548_v51 = vld [vmem:[#allocation2 + $0x88] sm:$0xf]  ;;  %v2137_v52 = vld [vmem:[#allocation2 + $0x94] sm:$0xf0]  ;;  %v1949_v54 = vor.u32 %v2237_v47, %v1948_v46 }
  0x47   :  { %910 = vmatpush.bf16.msrb.mxu0 %v1497_v61  ;;  %v1676_v53 = vld [vmem:[#allocation2 + $0x188] sm:$0xf]  ;;  %v2169_v55 = vld [vmem:[#allocation2 + $0x194] sm:$0xf0]  ;;  %v1549_v61 = vor.u32 %v2137_v52, %v1548_v51  ;;  %v1726_v52 = vld [vmem:[#allocation2 + $0x1f8] sm:$0xf0] }
  0x48   :  { %924 = vmatpush.bf16.msrb.mxu1 %v1625_v0  ;;  %v1804_v56 = vld [vmem:[#allocation2 + $0x288] sm:$0xf]  ;;  %v2201_v57 = vld [vmem:[#allocation2 + $0x294] sm:$0xf0]  ;;  %v1677_v62 = vor.u32 %v2169_v55, %v1676_v53  ;;  %v2211_v53 = vld [vmem:[#allocation2 + $0x2ec] sm:$0xf] }
  0x49   :  { %938 = vmatpush.bf16.msrb.mxu2 %v1753_v2  ;;  %v1932_v59 = vld [vmem:[#allocation2 + $0x388] sm:$0xf]  ;;  %v2233_v60 = vld [vmem:[#allocation2 + $0x394] sm:$0xf0]  ;;  %v1805_v63 = vor.u32 %v2201_v57, %v1804_v56  ;;  %v2243_v57 = vld [vmem:[#allocation2 + $0x3ec] sm:$0xf] }
  0x4a   :  { %952 = vmatpush.bf16.msrb.mxu3 %v1881_v6  ;;  %v1532_v0 = vld [vmem:[#allocation2 + $0x68] sm:$0xf]  ;;  %v2133_v2 = vld [vmem:[#allocation2 + $0x74] sm:$0xf0]  ;;  %v1933_v4 = vor.u32 %v2233_v60, %v1932_v59  ;;  %v1982_v59 = vld [vmem:[#allocation2 + $0x3f8] sm:$0xf0] }
  0x4b   :  { %911 = vmatpush.bf16.msrb.mxu0 %v1481_v14  ;;  %v1660_v3 = vld [vmem:[#allocation2 + $0x168] sm:$0xf]  ;;  %v2165_v5 = vld [vmem:[#allocation2 + $0x174] sm:$0xf0]  ;;  %v1533_v11 = vor.u32 %v2133_v2, %v1532_v0  ;;  %v2143_v0 = vld [vmem:[#allocation2 + $0xcc] sm:$0xf] }
  0x4c   :  { %925 = vmatpush.bf16.msrb.mxu1 %v1609_v19  ;;  %v1788_v6 = vld [vmem:[#allocation2 + $0x268] sm:$0xf]  ;;  %v2197_v7 = vld [vmem:[#allocation2 + $0x274] sm:$0xf0]  ;;  %v1661_v12 = vor.u32 %v2165_v5, %v1660_v3  ;;  %v1582_v2 = vld [vmem:[#allocation2 + $0xd8] sm:$0xf0] }
  0x4d   :  { %939 = vmatpush.bf16.msrb.mxu2 %v1737_v20  ;;  %v1916_v8 = vld [vmem:[#allocation2 + $0x368] sm:$0xf]  ;;  %v2229_v9 = vld [vmem:[#allocation2 + $0x374] sm:$0xf0]  ;;  %v1789_v13 = vor.u32 %v2197_v7, %v1788_v6  ;;  %v2175_v3 = vld [vmem:[#allocation2 + $0x1cc] sm:$0xf] }
  0x4e   :  { %953 = vmatpush.bf16.msrb.mxu3 %v1865_v23  ;;  %912 = vmatmul.bf16.vlgmr.msrb.gmra.mxu0 %v2443_v10  ;;  %v1516_v14 = vld [vmem:[#allocation2 + $0x48] sm:$0xf]  ;;  %v2129_v15 = vld [vmem:[#allocation2 + $0x54] sm:$0xf0]  ;;  %v1917_v18 = vor.u32 %v2229_v9, %v1916_v8  ;;  %v1710_v5 = vld [vmem:[#allocation2 + $0x1d8] sm:$0xf0] }
  0x4f   :  { %960 = vmatpush.bf16.msra.mxu0 %v1597_v24  ;;  %926 = vmatmul.bf16.vlgmr.msrb.gmra.mxu1 %v2448_v17  ;;  %v1644_v16 = vld [vmem:[#allocation2 + $0x148] sm:$0xf]  ;;  %v2161_v19 = vld [vmem:[#allocation2 + $0x154] sm:$0xf0]  ;;  %v1517_v24 = vor.u32 %v2129_v15, %v1516_v14  ;;  %v2207_v6 = vld [vmem:[#allocation2 + $0x2cc] sm:$0xf] }
  0x50   :  { %974 = vmatpush.bf16.msra.mxu1 %v1725_v25  ;;  %940 = vmatmul.bf16.vlgmr.msrb.gmra.mxu2 %v2425_v58  ;;  %v1772_v20 = vld [vmem:[#allocation2 + $0x248] sm:$0xf]  ;;  %v2193_v21 = vld [vmem:[#allocation2 + $0x254] sm:$0xf0]  ;;  %v1645_v25 = vor.u32 %v2161_v19, %v1644_v16  ;;  %v1838_v7 = vld [vmem:[#allocation2 + $0x2d8] sm:$0xf0] }
  0x51   :  { %988 = vmatpush.bf16.msra.mxu2 %v1853_v26  ;;  %954 = vmatmul.bf16.vlgmr.msrb.gmra.mxu3 %v2430_v1  ;;  %v1900_v22 = vld [vmem:[#allocation2 + $0x348] sm:$0xf]  ;;  %v2225_v23 = vld [vmem:[#allocation2 + $0x354] sm:$0xf0]  ;;  %v1773_v26 = vor.u32 %v2193_v21, %v1772_v20  ;;  %v2239_v8 = vld [vmem:[#allocation2 + $0x3cc] sm:$0xf] }
  0x52   :  { %1002 = vmatpush.bf16.msra.mxu3 %v1981_v30  ;;  %v1500_v27 = vld [vmem:[#allocation2 + $0x28] sm:$0xf]  ;;  %v2125_v28 = vld [vmem:[#allocation2 + $0x34] sm:$0xf0]  ;;  %v1901_v30 = vor.u32 %v2225_v23, %v1900_v22  ;;  %v1966_v9 = vld [vmem:[#allocation2 + $0x3d8] sm:$0xf0] }
  0x53   :  { %961 = vmatpush.bf16.msra.mxu0 %v1581_v36  ;;  %v1628_v29 = vld [vmem:[#allocation2 + $0x128] sm:$0xf]  ;;  %v2157_v31 = vld [vmem:[#allocation2 + $0x134] sm:$0xf0]  ;;  %v1501_v36 = vor.u32 %v2125_v28, %v1500_v27  ;;  %v2139_v14 = vld [vmem:[#allocation2 + $0xac] sm:$0xf] }
  0x54   :  { %975 = vmatpush.bf16.msra.mxu1 %v1709_v37  ;;  %v1756_v32 = vld [vmem:[#allocation2 + $0x228] sm:$0xf]  ;;  %v2189_v33 = vld [vmem:[#allocation2 + $0x234] sm:$0xf0]  ;;  %v1629_v39 = vor.u32 %v2157_v31, %v1628_v29  ;;  %v1566_v15 = vld [vmem:[#allocation2 + $0xb8] sm:$0xf0] }
  0x55   :  { %989 = vmatpush.bf16.msra.mxu2 %v1837_v38  ;;  %v1884_v34 = vld [vmem:[#allocation2 + $0x328] sm:$0xf]  ;;  %v2221_v35 = vld [vmem:[#allocation2 + $0x334] sm:$0xf0]  ;;  %v1757_v40 = vor.u32 %v2189_v33, %v1756_v32  ;;  %v2171_v16 = vld [vmem:[#allocation2 + $0x1ac] sm:$0xf] }
  0x56   :  { %1003 = vmatpush.bf16.msra.mxu3 %v1965_v42  ;;  %v1484_v37 = vld [vmem:[#allocation2 + $0x8] sm:$0xf]  ;;  %v2121_v38 = vld [vmem:[#allocation2 + $0x14] sm:$0xf0]  ;;  %v1885_v44 = vor.u32 %v2221_v35, %v1884_v34  ;;  %v1694_v19 = vld [vmem:[#allocation2 + $0x1b8] sm:$0xf0] }
  0x57   :  { %962 = vmatpush.bf16.msra.mxu0 %v1565_v48  ;;  %v1612_v41 = vld [vmem:[#allocation2 + $0x108] sm:$0xf]  ;;  %v2153_v42 = vld [vmem:[#allocation2 + $0x114] sm:$0xf0]  ;;  %v2147_v48 = vld [vmem:[#allocation2 + $0xec] sm:$0xf]  ;;  %v1485_v51 = vor.u32 %v2121_v38, %v1484_v37 }
  0x58   :  { %976 = vmatpush.bf16.msra.mxu1 %v1693_v49  ;;  %v1740_v43 = vld [vmem:[#allocation2 + $0x208] sm:$0xf]  ;;  %v2185_v45 = vld [vmem:[#allocation2 + $0x214] sm:$0xf0]  ;;  %v1598_v49 = vld [vmem:[#allocation2 + $0xf8] sm:$0xf0]  ;;  %v1613_v55 = vor.u32 %v2153_v42, %v1612_v41 }
  0x59   :  { %990 = vmatpush.bf16.msra.mxu2 %v1821_v50  ;;  %v1868_v46 = vld [vmem:[#allocation2 + $0x308] sm:$0xf]  ;;  %v2217_v47 = vld [vmem:[#allocation2 + $0x314] sm:$0xf0]  ;;  %v2179_v50 = vld [vmem:[#allocation2 + $0x1ec] sm:$0xf]  ;;  %v1741_v56 = vor.u32 %v2185_v45, %v1740_v43 }
  0x5a   :  { %1004 = vmatpush.bf16.msra.mxu3 %v1949_v54  ;;  %v1854_v54 = vld [vmem:[#allocation2 + $0x2f8] sm:$0xf0]  ;;  %v1869_v60 = vor.u32 %v2217_v47, %v1868_v46  ;;  %v2203_v20 = vld [vmem:[#allocation2 + $0x2ac] sm:$0xf] }
  0x5b   :  { %963 = vmatpush.bf16.msra.mxu0 %v1549_v61  ;;  %v1601_v61 = vor.u32 %v2147_v48, %v1598_v49  ;;  %v1822_v21 = vld [vmem:[#allocation2 + $0x2b8] sm:$0xf0]  ;;  %v2235_v22 = vld [vmem:[#allocation2 + $0x3ac] sm:$0xf] }
  0x5c   :  { %977 = vmatpush.bf16.msra.mxu1 %v1677_v62  ;;  %v1729_v62 = vor.u32 %v2179_v50, %v1726_v52  ;;  %v1950_v23 = vld [vmem:[#allocation2 + $0x3b8] sm:$0xf0]  ;;  %v2135_v27 = vld [vmem:[#allocation2 + $0x8c] sm:$0xf] }
  0x5d   :  { %991 = vmatpush.bf16.msra.mxu2 %v1805_v63  ;;  %v1857_v63 = vor.u32 %v2211_v53, %v1854_v54  ;;  %v1550_v28 = vld [vmem:[#allocation2 + $0x98] sm:$0xf0]  ;;  %v2167_v29 = vld [vmem:[#allocation2 + $0x18c] sm:$0xf] }
  0x5e   :  { %1005 = vmatpush.bf16.msra.mxu3 %v1933_v4  ;;  %v1985_v4 = vor.u32 %v2243_v57, %v1982_v59  ;;  %v1678_v31 = vld [vmem:[#allocation2 + $0x198] sm:$0xf0]  ;;  %v2199_v32 = vld [vmem:[#allocation2 + $0x28c] sm:$0xf] }
  0x5f   :  { %964 = vmatpush.bf16.msra.mxu0 %v1533_v11  ;;  %v1585_v11 = vor.u32 %v2143_v0, %v1582_v2  ;;  %v1806_v33 = vld [vmem:[#allocation2 + $0x298] sm:$0xf0]  ;;  %v2231_v34 = vld [vmem:[#allocation2 + $0x38c] sm:$0xf]  ;;  %v1681_v37 = vor.u32 %v2167_v29, %v1678_v31  ;;  %v2252_v29 = vld [vmem:[#allocation5 + $0x30] sm:$0xff] }
  0x60   :  { %978 = vmatpush.bf16.msra.mxu1 %v1661_v12  ;;  %v1713_v12 = vor.u32 %v2175_v3, %v1710_v5  ;;  %v1934_v35 = vld [vmem:[#allocation2 + $0x398] sm:$0xf0]  ;;  %v1809_v38 = vor.u32 %v2199_v32, %v1806_v33  ;;  %v2163_v41 = vld [vmem:[#allocation2 + $0x16c] sm:$0xf]  ;;  %v2250_v31 = vld [vmem:[#allocation5 + $0x20] sm:$0xff] }
  0x61   :  { %992 = vmatpush.bf16.msra.mxu2 %v1789_v13  ;;  %v1841_v13 = vor.u32 %v2207_v6, %v1838_v7  ;;  %v1937_v42 = vor.u32 %v2231_v34, %v1934_v35  ;;  %v1662_v43 = vld [vmem:[#allocation2 + $0x178] sm:$0xf0]  ;;  %v2227_v46 = vld [vmem:[#allocation2 + $0x36c] sm:$0xf]  ;;  %v2248_v34 = vld [vmem:[#allocation5 + $0x10] sm:$0xff] }
  0x62   :  { %1006 = vmatpush.bf16.msra.mxu3 %v1917_v18  ;;  %v1969_v18 = vor.u32 %v2239_v8, %v1966_v9  ;;  %v1790_v45 = vld [vmem:[#allocation2 + $0x278] sm:$0xf0]  ;;  %v1665_v49 = vor.u32 %v2163_v41, %v1662_v43  ;;  %v2159_v53 = vld [vmem:[#allocation2 + $0x14c] sm:$0xf]  ;;  %v2260_v35 = vld [vmem:[#allocation5 + $0x70] sm:$0xff] }
  0x63   :  { %965 = vmatpush.bf16.msra.mxu0 %v1517_v24  ;;  %v1569_v24 = vor.u32 %v2139_v14, %v1566_v15  ;;  %v1918_v47 = vld [vmem:[#allocation2 + $0x378] sm:$0xf0]  ;;  %v2223_v59 = vld [vmem:[#allocation2 + $0x34c] sm:$0xf]  ;;  %v2258_v41 = vld [vmem:[#allocation5 + $0x60] sm:$0xff] }
  0x64   :  { %979 = vmatpush.bf16.msra.mxu1 %v1645_v25  ;;  %v1697_v25 = vor.u32 %v2171_v16, %v1694_v19  ;;  %v1518_v52 = vld [vmem:[#allocation2 + $0x58] sm:$0xf0]  ;;  %v1921_v54 = vor.u32 %v2227_v46, %v1918_v47  ;;  %v2123_v0 = vld [vmem:[#allocation2 + $0x2c] sm:$0xf] }
  0x65   :  { %993 = vmatpush.bf16.msra.mxu2 %v1773_v26  ;;  %v1825_v26 = vor.u32 %v2203_v20, %v1822_v21  ;;  %v1774_v57 = vld [vmem:[#allocation2 + $0x258] sm:$0xf0]  ;;  %v2155_v3 = vld [vmem:[#allocation2 + $0x12c] sm:$0xf] }
  0x66   :  { %1007 = vmatpush.bf16.msra.mxu3 %v1901_v30  ;;  %v1953_v30 = vor.u32 %v2235_v22, %v1950_v23  ;;  %v1502_v2 = vld [vmem:[#allocation2 + $0x38] sm:$0xf0]  ;;  %v2187_v6 = vld [vmem:[#allocation2 + $0x22c] sm:$0xf] }
  0x67   :  { %966 = vmatpush.bf16.msra.mxu0 %v1501_v36  ;;  %v1553_v36 = vor.u32 %v2135_v27, %v1550_v28  ;;  %v1630_v5 = vld [vmem:[#allocation2 + $0x138] sm:$0xf0]  ;;  %v2219_v8 = vld [vmem:[#allocation2 + $0x32c] sm:$0xf] }
  0x68   :  { %980 = vmatpush.bf16.msra.mxu1 %v1629_v39  ;;  %v2131_v39 = vld [vmem:[#allocation2 + $0x6c] sm:$0xf]  ;;  %v1758_v7 = vld [vmem:[#allocation2 + $0x238] sm:$0xf0] }
  0x69   :  { %994 = vmatpush.bf16.msra.mxu2 %v1757_v40  ;;  %v1534_v40 = vld [vmem:[#allocation2 + $0x78] sm:$0xf0]  ;;  %v2119_v14 = vld [vmem:[#allocation2 + $0xc] sm:$0xf] }
  0x6a   :  { %1008 = vmatpush.bf16.msra.mxu3 %v1885_v44  ;;  %v2195_v44 = vld [vmem:[#allocation2 + $0x26c] sm:$0xf]  ;;  %v1537_v48 = vor.u32 %v2131_v39, %v1534_v40  ;;  %v1886_v9 = vld [vmem:[#allocation2 + $0x338] sm:$0xf0]  ;;  %v2467_v40 = vld [vmem:[%s2490_s2] sm:$0xf] }
  0x6b   :  { %967 = vmatpush.bf16.msra.mxu0 %v1485_v51  ;;  %v1793_v50 = vor.u32 %v2195_v44, %v1790_v45  ;;  %v2127_v51 = vld [vmem:[#allocation2 + $0x4c] sm:$0xf]  ;;  %v1486_v15 = vld [vmem:[#allocation2 + $0x18] sm:$0xf0]  ;;  %v1074_v44 = vperm.slane %v2467_v40, 0 }
  0x6c   :  { %981 = vmatpush.bf16.msra.mxu1 %v1613_v55  ;;  %v1646_v55 = vld [vmem:[#allocation2 + $0x158] sm:$0xf0]  ;;  %v2151_v16 = vld [vmem:[#allocation2 + $0x10c] sm:$0xf]  ;;  %v2473_v45 = vld [vmem:[%s2491_s3] sm:$0xf] }
  0x6d   :  { %995 = vmatpush.bf16.msra.mxu2 %v1741_v56  ;;  %v2191_v56 = vld [vmem:[#allocation2 + $0x24c] sm:$0xf]  ;;  %v1614_v19 = vld [vmem:[#allocation2 + $0x118] sm:$0xf0] }
  0x6e   :  { %1009 = vmatpush.bf16.msra.mxu3 %v1869_v60  ;;  %968 = vmatmul.bf16.vlgmr.msra.gmra.mxu0 %v2443_v10  ;;  %v1902_v60 = vld [vmem:[#allocation2 + $0x358] sm:$0xf0]  ;;  %v2183_v20 = vld [vmem:[#allocation2 + $0x20c] sm:$0xf] }
  0x6f   :  { %1016 = vmatpush.bf16.msrb.mxu0 %v1601_v61  ;;  %982 = vmatmul.bf16.vlgmr.msra.gmra.mxu1 %v2448_v17  ;;  %v1521_v61 = vor.u32 %v2127_v51, %v1518_v52  ;;  %v1742_v21 = vld [vmem:[#allocation2 + $0x218] sm:$0xf0]  ;;  %v2215_v22 = vld [vmem:[#allocation2 + $0x30c] sm:$0xf] }
  0x70   :  { %1030 = vmatpush.bf16.msrb.mxu1 %v1729_v62  ;;  %996 = vmatmul.bf16.vlgmr.msra.gmra.mxu2 %v2425_v58  ;;  %v1649_v62 = vor.u32 %v2159_v53, %v1646_v55  ;;  %v1870_v23 = vld [vmem:[#allocation2 + $0x318] sm:$0xf0] }
  0x71   :  { %1044 = vmatpush.bf16.msrb.mxu2 %v1857_v63  ;;  %1010 = vmatmul.bf16.vlgmr.msra.gmra.mxu3 %v2430_v1  ;;  %v1777_v63 = vor.u32 %v2191_v56, %v1774_v57  ;;  %v1873_v27 = vor.u32 %v2215_v22, %v1870_v23  ;;  %v2253_v28 = vld [vmem:[#allocation5 + $0x38] sm:$0xff]  ;;  %v1093_v22 = vperm.slane %v2473_v45, 1 }
  0x72   :  { %1058 = vmatpush.bf16.msrb.mxu3 %v1985_v4  ;;  %v1905_v4 = vor.u32 %v2223_v59, %v1902_v60  ;;  %v2261_v32 = vld [vmem:[#allocation5 + $0x78] sm:$0xff]  ;;  %v2255_v59 = vld [vmem:[#allocation5 + $0x48] sm:$0xff] }
  0x73   :  { %1017 = vmatpush.bf16.msrb.mxu0 %v1585_v11  ;;  %v1505_v11 = vor.u32 %v2123_v0, %v1502_v2  ;;  %v2249_v33 = vld [vmem:[#allocation5 + $0x18] sm:$0xff] }
  0x74   :  { %1031 = vmatpush.bf16.msrb.mxu1 %v1713_v12  ;;  %v1633_v12 = vor.u32 %v2155_v3, %v1630_v5  ;;  %v2257_v46 = vld [vmem:[#allocation5 + $0x58] sm:$0xff]  ;;  %v2268_v3 = vld [vmem:[#allocation5 + $0xb0] sm:$0xff] }
  0x75   :  { %1045 = vmatpush.bf16.msrb.mxu2 %v1841_v13  ;;  %v1761_v13 = vor.u32 %v2187_v6, %v1758_v7  ;;  %v2269_v0 = vld [vmem:[#allocation5 + $0xb8] sm:$0xff]  ;;  %v2267_v6 = vld [vmem:[#allocation5 + $0xa8] sm:$0xff] }
  0x76   :  { %1059 = vmatpush.bf16.msrb.mxu3 %v1969_v18  ;;  %v1889_v18 = vor.u32 %v2219_v8, %v1886_v9 }
  0x77   :  { %1018 = vmatpush.bf16.msrb.mxu0 %v1569_v24  ;;  %v1489_v24 = vor.u32 %v2119_v14, %v1486_v15  ;;  %v1075_v15 = vperm.slane %v2467_v40, 1 }
  0x78   :  { %1032 = vmatpush.bf16.msrb.mxu1 %v1697_v25  ;;  %v1617_v25 = vor.u32 %v2151_v16, %v1614_v19  ;;  %v2265_v19 = vld [vmem:[#allocation5 + $0x98] sm:$0xff] }
  0x79   :  { %1046 = vmatpush.bf16.msrb.mxu2 %v1825_v26  ;;  %v1745_v26 = vor.u32 %v2183_v20, %v1742_v21 }
  0x7a   :  { %1060 = vmatpush.bf16.msrb.mxu3 %v1953_v30  ;;  %v2251_v30 = vld [vmem:[#allocation5 + $0x28] sm:$0xff] }
  0x7b   :  { %1019 = vmatpush.bf16.msrb.mxu0 %v1553_v36 }
  0x7c   :  { %1033 = vmatpush.bf16.msrb.mxu1 %v1681_v37 }
  0x7d   :  { %1047 = vmatpush.bf16.msrb.mxu2 %v1809_v38 }
  0x7e   :  { %1061 = vmatpush.bf16.msrb.mxu3 %v1937_v42 }
  0x7f   :  { %1020 = vmatpush.bf16.msrb.mxu0 %v1537_v48 }
  0x80   :  { %1034 = vmatpush.bf16.msrb.mxu1 %v1665_v49 }
  0x81   :  { %1048 = vmatpush.bf16.msrb.mxu2 %v1793_v50  ;;  %v1092_v50 = vperm.slane %v2473_v45, 0 }
  0x82   :  { %1062 = vmatpush.bf16.msrb.mxu3 %v1921_v54  ;;  %v2256_v54 = vld [vmem:[#allocation5 + $0x50] sm:$0xff] }
  0x83   :  { %1021 = vmatpush.bf16.msrb.mxu0 %v1521_v61 }
  0x84   :  { %1035 = vmatpush.bf16.msrb.mxu1 %v1649_v62 }
  0x85   :  { %1049 = vmatpush.bf16.msrb.mxu2 %v1777_v63  ;;  %v2254_v63 = vld [vmem:[#allocation5 + $0x40] sm:$0xff] }
  0x86   :  { %1063 = vmatpush.bf16.msrb.mxu3 %v1905_v4 }
  0x87   :  { %1022 = vmatpush.bf16.msrb.mxu0 %v1505_v11  ;;  %v2266_v11 = vld [vmem:[#allocation5 + $0xa0] sm:$0xff] }
  0x88   :  { %1036 = vmatpush.bf16.msrb.mxu1 %v1633_v12 }
  0x89   :  { %1050 = vmatpush.bf16.msrb.mxu2 %v1761_v13 }
  0x8a   :  { %1064 = vmatpush.bf16.msrb.mxu3 %v1889_v18 }
  0x8b   :  { %1023 = vmatpush.bf16.msrb.mxu0 %v1489_v24  ;;  %v2264_v24 = vld [vmem:[#allocation5 + $0x90] sm:$0xff] }
  0x8c   :  { %1037 = vmatpush.bf16.msrb.mxu1 %v1617_v25 }
  0x8d   :  { %1051 = vmatpush.bf16.msrb.mxu2 %v1745_v26 }
  0x8e   :  { %1065 = vmatpush.bf16.msrb.mxu3 %v1873_v27  ;;  %1024 = vmatmul.bf16.vlgmr.msrb.gmra.mxu0 %v2443_v10  ;;  %v2247_v10 = vld [vmem:[#allocation5 + $0x8] sm:$0xff] }
  0x8f   :  { %1380 = vmatpush.bf16.msra.mxu0 %v2253_v28  ;;  %1038 = vmatmul.bf16.vlgmr.msrb.gmra.mxu1 %v2448_v17  ;;  %v2259_v17 = vld [vmem:[#allocation5 + $0x68] sm:$0xff] }
  0x90   :  { %1052 = vmatmul.bf16.vlgmr.msrb.gmra.mxu2 %v2425_v58  ;;  %1394 = vmatpush.bf16.msra.mxu1 %v2261_v32 }
  0x91   :  { %1066 = vmatmul.bf16.vlgmr.msrb.gmra.mxu3 %v2430_v1  ;;  %v2246_v1 = vld [vmem:[#allocation5] sm:$0xff]  ;;  %1408 = vmatpush.bf16.msra.mxu2 %v2269_v0 }
  0x93   :  { %1381 = vmatpush.bf16.msra.mxu0 %v2252_v29  ;;  %v2263_v29 = vld [vmem:[#allocation5 + $0x88] sm:$0xff] }
  0x94   :  { %1395 = vmatpush.bf16.msra.mxu1 %v2260_v35  ;;  %v2277_v35 = vld [vmem:[#allocation5 + $0xf8] sm:$0xff] }
  0x95   :  { %1409 = vmatpush.bf16.msra.mxu2 %v2268_v3  ;;  %1422 = vmatpush.bf16.msra.mxu3 %v2277_v35 }
  0x97   :  { %1382 = vmatpush.bf16.msra.mxu0 %v2251_v30 }
  0x98   :  { %1396 = vmatpush.bf16.msra.mxu1 %v2259_v17  ;;  %v2276_v17 = vld [vmem:[#allocation5 + $0xf0] sm:$0xff] }
  0x99   :  { %1410 = vmatpush.bf16.msra.mxu2 %v2267_v6  ;;  %1423 = vmatpush.bf16.msra.mxu3 %v2276_v17 }
  0x9b   :  { %1383 = vmatpush.bf16.msra.mxu0 %v2250_v31 }
  0x9c   :  { %1397 = vmatpush.bf16.msra.mxu1 %v2258_v41 }
  0x9d   :  { %1411 = vmatpush.bf16.msra.mxu2 %v2266_v11 }
  0x9f   :  { %1384 = vmatpush.bf16.msra.mxu0 %v2249_v33  ;;  %v2262_v33 = vld [vmem:[#allocation5 + $0x80] sm:$0xff] }
  0xa0   :  { %1398 = vmatpush.bf16.msra.mxu1 %v2257_v46 }
  0xa1   :  { %1412 = vmatpush.bf16.msra.mxu2 %v2265_v19 }
  0xa3   :  { %1385 = vmatpush.bf16.msra.mxu0 %v2248_v34 }
  0xa4   :  { %1399 = vmatpush.bf16.msra.mxu1 %v2256_v54 }
  0xa5   :  { %1413 = vmatpush.bf16.msra.mxu2 %v2264_v24 }
  0xa7   :  { %1386 = vmatpush.bf16.msra.mxu0 %v2247_v10 }
  0xa8   :  { %1400 = vmatpush.bf16.msra.mxu1 %v2255_v59  ;;  %v2271_v59 = vld [vmem:[#allocation5 + $0xc8] sm:$0xff] }
  0xa9   :  { %1414 = vmatpush.bf16.msra.mxu2 %v2263_v29 }
  0xab   :  { %1387 = vmatpush.bf16.msra.mxu0 %v2246_v1 }
  0xac   :  { %1401 = vmatpush.bf16.msra.mxu1 %v2254_v63  ;;  %v2270_v63 = vld [vmem:[#allocation5 + $0xc0] sm:$0xff] }
  0xad   :  { %1415 = vmatpush.bf16.msra.mxu2 %v2262_v33 }
  0xaf   :  { %v857_v58 = vpop.f32.mrf.mxu0 }
  0xb0   :  { %v871_v36 = vpop.f32.mrf.mxu1 }
  0xb1   :  { %v872_v37 = vadd.f32 %v871_v36, %v857_v58  ;;  %v2275_v58 = vld [vmem:[#allocation5 + $0xe8] sm:$0xff] }
  0xb2   :  { %1424 = vmatpush.bf16.msra.mxu3 %v2275_v58 }
  0xb3   :  { %v885_v38 = vpop.f32.mrf.mxu2 }
  0xb4   :  { %v899_v39 = vpop.f32.mrf.mxu3  ;;  %v886_v42 = vadd.f32 %v885_v38, %v872_v37  ;;  %v2274_v38 = vld [vmem:[#allocation5 + $0xe0] sm:$0xff] }
  0xb6   :  { %v900_v43 = vadd.f32 %v899_v39, %v886_v42  ;;  %1425 = vmatpush.bf16.msra.mxu3 %v2274_v38 }
  0xb7   :  { %v859_v47 = vpop.f32.mrf.mxu0 }
  0xb8   :  { %v873_v48 = vpop.f32.mrf.mxu1  ;;  %v1082_v49 = vmul.f32 %v1074_v44, %v900_v43 }
  0xb9   :  { %v874_v51 = vadd.f32 %v873_v48, %v859_v47  ;;  %v2273_v47 = vld [vmem:[#allocation5 + $0xd8] sm:$0xff] }
  0xba   :  { %v1100_v56 = vadd.f32 %v1092_v50, %v1082_v49  ;;  %1426 = vmatpush.bf16.msra.mxu3 %v2273_v47 }
  0xbb   :  { %v887_v52 = vpop.f32.mrf.mxu2 }
  0xbc   :  { %v901_v53 = vpop.f32.mrf.mxu3  ;;  %v888_v55 = vadd.f32 %v887_v52, %v874_v51  ;;  %v1108_v61 = vmax.f32 %v1100_v56, 0.0  ;;  %v1094_v51 = vperm.slane %v2473_v45, 2  ;;  %v2272_v52 = vld [vmem:[#allocation5 + $0xd0] sm:$0xff] }
  0xbe   :  { %v902_v57 = vadd.f32 %v901_v53, %v888_v55  ;;  %1427 = vmatpush.bf16.msra.mxu3 %v2272_v52 }
  0xc0   :  { %v1086_v60 = vmul.f32 %v1074_v44, %v902_v57  ;;  %v1076_v44 = vperm.slane %v2467_v40, 2 }
  0xc2   :  { %v1104_v62 = vadd.f32 %v1092_v50, %v1086_v60  ;;  %1428 = vmatpush.bf16.msra.mxu3 %v2271_v59 }
  0xc4   :  { %v1112_v2 = vmax.f32 %v1104_v62, 0.0 }
  0xc6   :  { %v1116_v4 = vpack.c.bf16 %v1112_v2, %v1108_v61  ;;  %1429 = vmatpush.bf16.msra.mxu3 %v2270_v63 }
  0xc8   :  { %1388 = vmatmul.bf16.vlgmr.msra.gmra.mxu0 %v1116_v4 }
  0xcb   :  { %v913_v5 = vpop.f32.mrf.mxu0 }
  0xcc   :  { %v927_v7 = vpop.f32.mrf.mxu1 }
  0xcd   :  { %v928_v8 = vadd.f32 %v927_v7, %v913_v5 }
  0xd3   :  { %v941_v9 = vpop.f32.mrf.mxu2  ;;  %v915_v16 = vpop.f32.mrf.mxu0 }
  0xd4   :  { %v942_v12 = vadd.f32 %v941_v9, %v928_v8  ;;  %v955_v13 = vpop.f32.mrf.mxu3  ;;  %v929_v18 = vpop.f32.mrf.mxu1 }
  0xd5   :  { %v930_v20 = vadd.f32 %v929_v18, %v915_v16  ;;  %v1095_v18 = vperm.slane %v2473_v45, 3 }
  0xd6   :  { %v956_v14 = vadd.f32 %v955_v13, %v942_v12  ;;  %v1077_v13 = vperm.slane %v2467_v40, 3  ;;  %v2287_v40 = vld [vmem:[%s2493_s5] ss:$0 sm:$0xff]  ;;  %s2373_s5 = smov 128  }
  0xd8   :  { %v1083_v21 = vmul.f32 %v1075_v15, %v956_v14 }
  0xda   :  { %v1101_v27 = vadd.f32 %v1093_v22, %v1083_v21 }
  0xdb   :  { %v943_v23 = vpop.f32.mrf.mxu2 }
  0xdc   :  { %v944_v25 = vadd.f32 %v943_v23, %v930_v20  ;;  %v957_v26 = vpop.f32.mrf.mxu3  ;;  %v1109_v31 = vmax.f32 %v1101_v27, 0.0 }
  0xde   :  { %v958_v28 = vadd.f32 %v957_v26, %v944_v25 }
  0xe0   :  { %v1087_v30 = vmul.f32 %v1075_v15, %v958_v28 }
  0xe2   :  { %v1105_v32 = vadd.f32 %v1093_v22, %v1087_v30 }
  0xe4   :  { %v1113_v34 = vmax.f32 %v1105_v32, 0.0 }
  0xe6   :  { %v1117_v10 = vpack.c.bf16 %v1113_v34, %v1109_v31 }
  0xe8   :  { %1402 = vmatmul.bf16.vlgmr.msra.gmra.mxu1 %v1117_v10 }
  0xeb   :  { %v969_v36 = vpop.f32.mrf.mxu0 }
  0xec   :  { %v983_v1 = vpop.f32.mrf.mxu1 }
  0xed   :  { %v984_v37 = vadd.f32 %v983_v1, %v969_v36 }
  0xf3   :  { %v997_v39 = vpop.f32.mrf.mxu2  ;;  %v971_v46 = vpop.f32.mrf.mxu0 }
  0xf4   :  { %v998_v41 = vadd.f32 %v997_v39, %v984_v37  ;;  %v1011_v42 = vpop.f32.mrf.mxu3  ;;  %v985_v48 = vpop.f32.mrf.mxu1 }
  0xf5   :  { %v986_v49 = vadd.f32 %v985_v48, %v971_v46 }
  0xf6   :  { %v1012_v43 = vadd.f32 %v1011_v42, %v998_v41 }
  0xf8   :  { %v1084_v50 = vmul.f32 %v1076_v44, %v1012_v43 }
  0xfa   :  { %v1102_v56 = vadd.f32 %v1094_v51, %v1084_v50 }
  0xfb   :  { %v999_v53 = vpop.f32.mrf.mxu2 }
  0xfc   :  { %v1000_v54 = vadd.f32 %v999_v53, %v986_v49  ;;  %v1013_v55 = vpop.f32.mrf.mxu3  ;;  %v1110_v61 = vmax.f32 %v1102_v56, 0.0 }
  0xfe   :  { %v1014_v57 = vadd.f32 %v1013_v55, %v1000_v54 }
 0x100   :  { %v1088_v60 = vmul.f32 %v1076_v44, %v1014_v57 }
 0x102   :  { %v1106_v62 = vadd.f32 %v1094_v51, %v1088_v60 }
 0x104   :  { %v1114_v0 = vmax.f32 %v1106_v62, 0.0 }
 0x106   :  { %v1118_v2 = vpack.c.bf16 %v1114_v0, %v1110_v61 }
 0x108   :  { %1416 = vmatmul.bf16.vlgmr.msra.gmra.mxu2 %v1118_v2 }
 0x10b   :  { %v1025_v3 = vpop.f32.mrf.mxu0 }
 0x10c   :  { %v1039_v4 = vpop.f32.mrf.mxu1 }
 0x10d   :  { %v1040_v5 = vadd.f32 %v1039_v4, %v1025_v3 }
 0x113   :  { %v1053_v6 = vpop.f32.mrf.mxu2  ;;  %v1027_v9 = vpop.f32.mrf.mxu0 }
 0x114   :  { %v1054_v7 = vadd.f32 %v1053_v6, %v1040_v5  ;;  %v1067_v8 = vpop.f32.mrf.mxu3  ;;  %v1041_v11 = vpop.f32.mrf.mxu1 }
 0x115   :  { %v1042_v14 = vadd.f32 %v1041_v11, %v1027_v9 }
 0x116   :  { %v1068_v12 = vadd.f32 %v1067_v8, %v1054_v7 }
 0x118   :  { %v1085_v16 = vmul.f32 %v1077_v13, %v1068_v12 }
 0x11a   :  { %v1103_v22 = vadd.f32 %v1095_v18, %v1085_v16 }
 0x11b   :  { %v1055_v15 = vpop.f32.mrf.mxu2 }
 0x11c   :  { %v1056_v19 = vadd.f32 %v1055_v15, %v1042_v14  ;;  %v1069_v20 = vpop.f32.mrf.mxu3  ;;  %v1111_v25 = vmax.f32 %v1103_v22, 0.0 }
 0x11e   :  { %v1070_v21 = vadd.f32 %v1069_v20, %v1056_v19 }
 0x120   :  { %v1089_v23 = vmul.f32 %v1077_v13, %v1070_v21 }
 0x122   :  { %v1107_v24 = vadd.f32 %v1095_v18, %v1089_v23 }
 0x124   :  { %v1115_v26 = vmax.f32 %v1107_v24, 0.0 }
 0x126   :  { %v1119_v27 = vpack.c.bf16 %v1115_v26, %v1111_v25 }
 0x128   :  { %1430 = vmatmul.bf16.vlgmr.msra.gmra.mxu3 %v1119_v27 }
 0x145   :  { %v1389_v28 = vpop.f32.mrf.mxu0 }
 0x146   :  { %v1390_v31 = vadd.f32 %v2287_v40, %v1389_v28 }
 0x14d   :  { %v1391_v33 = vpop.f32.mrf.mxu0 }
 0x14e   :  { %v1392_v17 = vadd.f32 %v2287_v40, %v1391_v33 }
 0x165   :  { %v1403_v29 = vpop.f32.mrf.mxu1 }
 0x166   :  { %v1404_v32 = vadd.f32 %v1403_v29, %v1390_v31 }
 0x16d   :  { %v1405_v10 = vpop.f32.mrf.mxu1 }
 0x16e   :  { %v1406_v36 = vadd.f32 %v1405_v10, %v1392_v17 }
 0x18b   :  { %v1417_v30 = vpop.f32.mrf.mxu2 }
 0x18c   :  { %v1418_v45 = vadd.f32 %v1417_v30, %v1404_v32 }
 0x193   :  { %v1419_v58 = vpop.f32.mrf.mxu2 }
 0x194   :  { %v1420_v1 = vadd.f32 %v1419_v58, %v1406_v36 }
 0x1ab   :  { %v1431_v34 = vpop.f32.mrf.mxu3 }
 0x1ac   :  { %v1432_v35 = vadd.f32 %v1431_v34, %v1418_v45 }
 0x1ae   :  { %1436 = vst [vmem:[#allocation7] sm:$0xff] %v1432_v35 }
 0x1b3   :  { %v1433_v37 = vpop.f32.mrf.mxu3 }
 0x1b4   :  { %v1434_v38 = vadd.f32 %v1433_v37, %v1420_v1 }
 0x1b6   :  { %1437 = vst [vmem:[#allocation7 + $0x8] sm:$0xff] %v1434_v38 }
 0x1b7   :  { %1450 = dma.vmem_to_hbm [thread:$0]  %s1443_s29, 256, %s1445_s8, [#allocation4], %s2373_s5, %s2373_s5, %s2374_s9  }
 0x1b8   :  { %2364 = dma.done.wait [#allocation4], 256  }
 0x1b9   :  { %2365 = vsyncadd [#allocation4], 4294967040 }
 0x1ba   :  { %1455 = vsyncpa [#allocation3], 1 }
 0x1bb   :  { %1456 = vsyncpa [#allocation6], 1 }
 0x1bc   :  { %1457 = vsyncpa [#allocation4], 1 }

</bundles_post_ra>
